<compile_context>
chip_gen: v6e
topology: v6e:2x2x1
jax: 0.10.0
libtpu: 0.0.40
codegen_flags: <defaults>
</compile_context>

<pallas_src>
import jax
import jax.numpy as jnp
import numpy as np
from jax.experimental import pallas as pl
from jax.experimental.pallas import tpu as pltpu

# 4096 rows x 128 lanes = 512K elems per channel plane -> ~6 MiB f32 block;
# in + out, double-buffered ~= 24 MiB of VMEM.
_MAX_ROWS_PER_BLOCK = 4096


def _hue_kernel(shift_ref, x_ref, o_ref):
    """x_ref / o_ref: (3, R, L) block of one sample (raw [-1, 1] values).
    shift_ref: (B,) f32 in SMEM, per-sample hue shift in sixths of a turn."""
    b = pl.program_id(0)
    shift6 = shift_ref[b]                          # scalar, in [-3, 3]

    r = x_ref[0, :, :].astype(jnp.float32)
    g = x_ref[1, :, :].astype(jnp.float32)
    bl = x_ref[2, :, :].astype(jnp.float32)

    # Hue rotation commutes with the (x+1)/2 normalisation (positive affine map):
    # ratios / comparisons / weights are invariant and the de-normalised output
    # is exactly maxc - delta * w on the raw values, so no normalisation here.
    maxc = jnp.maximum(jnp.maximum(r, g), bl)      # value  (unchanged by hue)
    minc = jnp.minimum(jnp.minimum(r, g), bl)
    delta = maxc - minc                            # chroma (unchanged by hue)
    # One exact reciprocal shared by all three branches (keeps 1e-5 tolerance).
    inv = 1.0 / jnp.where(delta > 0.0, delta, 1.0)

    # RGB -> hue in [0, 6) with compare+select range reduction (no float mod).
    hr = (g - bl) * inv                            # in [-1, 1] when maxc == r
    hr = jnp.where(hr < 0.0, hr + 6.0, hr)
    hg = (bl - r) * inv + 2.0                      # in [1, 3]  when maxc == g
    hb = (r - g) * inv + 4.0                       # in [3, 5]  when maxc == b
    h6 = jnp.where(maxc == r, hr, jnp.where(maxc == g, hg, hb))

    # Apply per-sample shift; h6 + shift6 in (-3, 9) -> two selects replace mod 6.
    h6 = h6 + shift6
    h6 = jnp.where(h6 < 0.0, h6 + 6.0, h6)
    h6 = jnp.where(h6 >= 6.0, h6 - 6.0, h6)

    # HSV -> RGB with unchanged V and V*S:
    #   f(n) = V - (V*S) * clip(min(k, 4 - k), 0, 1),   k = (n + h6) mod 6
    def chan(n):
        k = h6 + n                                 # in [1, 11): one select for mod 6
        k = jnp.where(k >= 6.0, k - 6.0, k)
        return maxc - delta * jnp.clip(jnp.minimum(k, 4.0 - k), 0.0, 1.0)

    o_ref[0, :, :] = chan(5.0).astype(o_ref.dtype)
    o_ref[1, :, :] = chan(3.0).astype(o_ref.dtype)
    o_ref[2, :, :] = chan(1.0).astype(o_ref.dtype)


def _pick_row_tile(rows, sub):
    """Largest row-tile that divides `rows`, is a multiple of the sublane
    quantum and keeps one (3, TR, 128) block around a few MiB."""
    cap = (min(rows, _MAX_ROWS_PER_BLOCK) // sub) * sub
    t = cap
    while t >= sub:
        if rows % t == 0:
            return t
        t -= sub
    return rows  # no sublane-aligned divisor: whole plane in one block (correct)


def hue_forward(image, hue_factors):
    """image: (B, 3, H, W) in [-1, 1]. hue_factors: (B,) hue shift in turns."""
    B, C, H, W = image.shape
    assert C == 3, "hue jitter needs RGB (3-channel) input"
    shift6 = jnp.asarray(hue_factors, jnp.float32) * jnp.float32(6.0)

    N = H * W
    itemsize = jnp.dtype(image.dtype).itemsize
    sub = {4: 8, 2: 16, 1: 32}.get(itemsize, 8)

    if N % 128 == 0:
        # Lane-dense layout: fold the flattened H*W into (rows, 128) so the
        # lane dim is always a full 128 (unmasked loads/stores everywhere).
        rows = N // 128
        x = image.reshape(B, 3, rows, 128)
        tr = _pick_row_tile(rows, sub)
        grid = (B, rows // tr)
        block = (None, 3, tr, 128)
    else:
        # TODO(synk): H*W not a multiple of 128 -> one lane-sparse block per
        # sample (still correct, just masked stores / larger VMEM footprint).
        x = image.reshape(B, 3, 1, N)
        grid = (B, 1)
        block = (None, 3, 1, N)

    cost = pl.CostEstimate(
        flops=int(40 * B * N),                     # ~40 VPU ops per pixel
        transcendentals=0,
        bytes_accessed=int(2 * B * C * N * itemsize),
    )

    out = pl.pallas_call(
        _hue_kernel,
        out_shape=jax.ShapeDtypeStruct(x.shape, image.dtype),
        grid_spec=pltpu.PrefetchScalarGridSpec(
            num_scalar_prefetch=1,
            grid=grid,
            in_specs=[pl.BlockSpec(block, lambda b, i, s: (b, 0, i, 0))],
            out_specs=pl.BlockSpec(block, lambda b, i, s: (b, 0, i, 0)),
        ),
        compiler_params=pltpu.CompilerParams(
            dimension_semantics=("parallel", "parallel"),
            vmem_limit_bytes=40 * 1024 * 1024,
        ),
        cost_estimate=cost,
    )(shift6, x)
    return out.reshape(B, C, H, W)


def _hue_forward_ref(image, hue_factors):
    """Pure-JAX reference of the original normalised formulation."""
    img = (jnp.asarray(image, jnp.float32) + 1.0) * 0.5
    r, g, b = img[:, 0], img[:, 1], img[:, 2]
    maxc = jnp.maximum(jnp.maximum(r, g), b)
    minc = jnp.minimum(jnp.minimum(r, g), b)
    delta = maxc - minc
    safe = jnp.where(delta > 0.0, delta, 1.0)
    h6 = jnp.where(
        maxc == r,
        jnp.mod((g - b) / safe, 6.0),
        jnp.where(maxc == g, (b - r) / safe + 2.0, (r - g) / safe + 4.0),
    )
    h6 = jnp.mod(h6 + (jnp.asarray(hue_factors, jnp.float32) * 6.0)[:, None, None], 6.0)

    def chan(n):
        k = jnp.mod(h6 + n, 6.0)
        return maxc - delta * jnp.clip(jnp.minimum(k, 4.0 - k), 0.0, 1.0)

    out01 = jnp.stack([chan(5.0), chan(3.0), chan(1.0)], axis=1)
    return (out01 * 2.0 - 1.0).astype(image.dtype)


class Hue:
    """Mirror of the PyTorch module: forward takes (image, cover, mask)."""

    def __init__(self, hue=0.1, p=1, seed=0):
        self.hue = float(hue)
        self.p = float(p)
        self._key = jax.random.PRNGKey(seed)

    def __call__(self, image_cover_mask):
        image = image_cover_mask[0]
        B = image.shape[0]
        self._key, k_hue, k_p = jax.random.split(self._key, 3)
        factors = jax.random.uniform(
            k_hue, (B,), jnp.float32, minval=-self.hue, maxval=self.hue
        )
        if self.p < 1.0:
            # TODO(synk): p<1 approximated by a zero hue shift on unselected
            # samples (identical up to f32 rounding, not bit-exact).
            apply = jax.random.bernoulli(k_p, self.p, (B,))
            factors = jnp.where(apply, factors, 0.0)
        return hue_forward(image, factors)


if __name__ == "__main__":
    key = jax.random.PRNGKey(0)
    k_img, k_cov, k_msk, k_hue = jax.random.split(key, 4)

    B, C, H, W = 2, 3, 16, 16
    image = jax.random.uniform(k_img, (B, C, H, W), jnp.float32, minval=-1.0, maxval=1.0)
    cover = jax.random.uniform(k_cov, (B, C, H, W), jnp.float32, minval=-1.0, maxval=1.0)
    mask = jax.random.uniform(k_msk, (B, 1, H, W), jnp.float32)

    # End-to-end module call (fresh random hue per call, like kornia).
    layer = Hue(hue=0.1, p=1, seed=0)
    out = jax.block_until_ready(layer((image, cover, mask)))
    assert out.shape == image.shape and out.dtype == image.dtype
    out_np = np.asarray(out)
    assert np.all(np.isfinite(out_np))
    assert out_np.min() >= -1.0 - 1e-5 and out_np.max() <= 1.0 + 1e-5

    # Kernel vs pure-JAX reference with explicit hue factors.
    factors = jax.random.uniform(k_hue, (B,), jnp.float32, minval=-0.1, maxval=0.1)
    out_k = np.asarray(jax.block_until_ready(hue_forward(image, factors)))
    out_r = np.asarray(_hue_forward_ref(image, factors))
    assert np.allclose(out_k, out_r, atol=1e-5), float(np.abs(out_k - out_r).max())

    # Hue rotation preserves per-pixel channel max and min (value & chroma).
    in01 = (np.asarray(image) + 1.0) * 0.5
    out01 = (out_k + 1.0) * 0.5
    assert np.allclose(in01.max(1), out01.max(1), atol=1e-5)
    assert np.allclose(in01.min(1), out01.min(1), atol=1e-5)
    # Noise actually applied (hue shift changes chromatic pixels).
    assert np.abs(out_k - np.asarray(image)).max() > 1e-3

    print("KERNEL_OK")
</pallas_src>

<mosaic_0001>
module attributes {stable_mosaic.version = 11 : i64} {
  func.func @_hue_kernel(%arg0: i32, %arg1: i32, %arg2: memref<2xf32, #tpu.memory_space<smem>>, %arg3: memref<1x3x2x128xf32, #tpu.memory_space<vmem>>, %arg4: memref<1x3x2x128xf32, #tpu.memory_space<vmem>>) attributes {dimension_semantics = [#tpu.dimension_semantics<parallel>, #tpu.dimension_semantics<parallel>], iteration_bounds = array<i64: 2, 1>, scalar_prefetch = 1 : i64, scratch_operands = 0 : i64, tpu.core_type = #tpu.core_type<tc>, window_params = [{transform_indices = @transform_0, window_bounds = array<i64: 1, 3, 2, 128>}, {transform_indices = @transform_1, window_bounds = array<i64: 1, 3, 2, 128>}]} {
    %0 = arith.index_cast %arg0 : i32 to index
    %1 = memref.load %arg2[%0] : memref<2xf32, #tpu.memory_space<smem>>
    %c0 = arith.constant 0 : index
    %c0_0 = arith.constant 0 : index
    %c0_1 = arith.constant 0 : index
    %c0_2 = arith.constant 0 : index
    %2 = vector.load %arg3[%c0, %c0_0, %c0_1, %c0_2] : memref<1x3x2x128xf32, #tpu.memory_space<vmem>>, vector<1x1x2x128xf32>
    %3 = vector.shape_cast %2 : vector<1x1x2x128xf32> to vector<2x128xf32>
    %c0_3 = arith.constant 0 : index
    %c1 = arith.constant 1 : index
    %c0_4 = arith.constant 0 : index
    %c0_5 = arith.constant 0 : index
    %4 = vector.load %arg3[%c0_3, %c1, %c0_4, %c0_5] : memref<1x3x2x128xf32, #tpu.memory_space<vmem>>, vector<1x1x2x128xf32>
    %5 = vector.shape_cast %4 : vector<1x1x2x128xf32> to vector<2x128xf32>
    %c0_6 = arith.constant 0 : index
    %c2 = arith.constant 2 : index
    %c0_7 = arith.constant 0 : index
    %c0_8 = arith.constant 0 : index
    %6 = vector.load %arg3[%c0_6, %c2, %c0_7, %c0_8] : memref<1x3x2x128xf32, #tpu.memory_space<vmem>>, vector<1x1x2x128xf32>
    %7 = vector.shape_cast %6 : vector<1x1x2x128xf32> to vector<2x128xf32>
    %8 = arith.maximumf %3, %5 : vector<2x128xf32>
    %9 = arith.maximumf %8, %7 : vector<2x128xf32>
    %10 = arith.minimumf %3, %5 : vector<2x128xf32>
    %11 = arith.minimumf %10, %7 : vector<2x128xf32>
    %12 = arith.subf %9, %11 : vector<2x128xf32>
    %cst = arith.constant 0.000000e+00 : f32
    %13 = vector.broadcast %cst : f32 to vector<2x128xf32>
    %14 = arith.cmpf ogt, %12, %13 : vector<2x128xf32>
    %cst_9 = arith.constant 1.000000e+00 : f32
    %15 = vector.broadcast %cst_9 : f32 to vector<2x128xf32>
    %16 = arith.select %14, %12, %15 : vector<2x128xi1>, vector<2x128xf32>
    %cst_10 = arith.constant 1.000000e+00 : f32
    %17 = vector.broadcast %cst_10 : f32 to vector<2x128xf32>
    %18 = arith.divf %17, %16 : vector<2x128xf32>
    %19 = arith.subf %5, %7 : vector<2x128xf32>
    %20 = arith.mulf %19, %18 : vector<2x128xf32>
    %cst_11 = arith.constant 0.000000e+00 : f32
    %21 = vector.broadcast %cst_11 : f32 to vector<2x128xf32>
    %22 = arith.cmpf olt, %20, %21 : vector<2x128xf32>
    %cst_12 = arith.constant 6.000000e+00 : f32
    %23 = vector.broadcast %cst_12 : f32 to vector<2x128xf32>
    %24 = arith.addf %20, %23 : vector<2x128xf32>
    %25 = arith.select %22, %24, %20 : vector<2x128xi1>, vector<2x128xf32>
    %26 = arith.subf %7, %3 : vector<2x128xf32>
    %27 = arith.mulf %26, %18 : vector<2x128xf32>
    %cst_13 = arith.constant 2.000000e+00 : f32
    %28 = vector.broadcast %cst_13 : f32 to vector<2x128xf32>
    %29 = arith.addf %27, %28 : vector<2x128xf32>
    %30 = arith.subf %3, %5 : vector<2x128xf32>
    %31 = arith.mulf %30, %18 : vector<2x128xf32>
    %cst_14 = arith.constant 4.000000e+00 : f32
    %32 = vector.broadcast %cst_14 : f32 to vector<2x128xf32>
    %33 = arith.addf %31, %32 : vector<2x128xf32>
    %34 = arith.cmpf oeq, %9, %3 : vector<2x128xf32>
    %35 = arith.cmpf oeq, %9, %5 : vector<2x128xf32>
    %36 = arith.select %35, %29, %33 : vector<2x128xi1>, vector<2x128xf32>
    %37 = arith.select %34, %25, %36 : vector<2x128xi1>, vector<2x128xf32>
    %38 = vector.broadcast %1 : f32 to vector<2x128xf32>
    %39 = arith.addf %37, %38 : vector<2x128xf32>
    %cst_15 = arith.constant 0.000000e+00 : f32
    %40 = vector.broadcast %cst_15 : f32 to vector<2x128xf32>
    %41 = arith.cmpf olt, %39, %40 : vector<2x128xf32>
    %cst_16 = arith.constant 6.000000e+00 : f32
    %42 = vector.broadcast %cst_16 : f32 to vector<2x128xf32>
    %43 = arith.addf %39, %42 : vector<2x128xf32>
    %44 = arith.select %41, %43, %39 : vector<2x128xi1>, vector<2x128xf32>
    %cst_17 = arith.constant 6.000000e+00 : f32
    %45 = vector.broadcast %cst_17 : f32 to vector<2x128xf32>
    %46 = arith.cmpf oge, %44, %45 : vector<2x128xf32>
    %cst_18 = arith.constant 6.000000e+00 : f32
    %47 = vector.broadcast %cst_18 : f32 to vector<2x128xf32>
    %48 = arith.subf %44, %47 : vector<2x128xf32>
    %49 = arith.select %46, %48, %44 : vector<2x128xi1>, vector<2x128xf32>
    %cst_19 = arith.constant 5.000000e+00 : f32
    %50 = vector.broadcast %cst_19 : f32 to vector<2x128xf32>
    %51 = arith.addf %49, %50 : vector<2x128xf32>
    %cst_20 = arith.constant 6.000000e+00 : f32
    %52 = vector.broadcast %cst_20 : f32 to vector<2x128xf32>
    %53 = arith.cmpf oge, %51, %52 : vector<2x128xf32>
    %cst_21 = arith.constant 6.000000e+00 : f32
    %54 = vector.broadcast %cst_21 : f32 to vector<2x128xf32>
    %55 = arith.subf %51, %54 : vector<2x128xf32>
    %56 = arith.select %53, %55, %51 : vector<2x128xi1>, vector<2x128xf32>
    %cst_22 = arith.constant 4.000000e+00 : f32
    %57 = vector.broadcast %cst_22 : f32 to vector<2x128xf32>
    %58 = arith.subf %57, %56 : vector<2x128xf32>
    %59 = arith.minimumf %56, %58 : vector<2x128xf32>
    %cst_23 = arith.constant 0.000000e+00 : f32
    %cst_24 = arith.constant 1.000000e+00 : f32
    %60 = vector.broadcast %cst_23 : f32 to vector<2x128xf32>
    %61 = arith.maximumf %60, %59 : vector<2x128xf32>
    %62 = vector.broadcast %cst_24 : f32 to vector<2x128xf32>
    %63 = arith.minimumf %62, %61 : vector<2x128xf32>
    %64 = arith.mulf %12, %63 : vector<2x128xf32>
    %65 = arith.subf %9, %64 : vector<2x128xf32>
    %c0_25 = arith.constant 0 : index
    %c0_26 = arith.constant 0 : index
    %c0_27 = arith.constant 0 : index
    %c0_28 = arith.constant 0 : index
    %66 = vector.load %arg4[%c0_25, %c0_26, %c0_27, %c0_28] : memref<1x3x2x128xf32, #tpu.memory_space<vmem>>, vector<1x1x2x128xf32>
    %67 = vector.shape_cast %66 : vector<1x1x2x128xf32> to vector<2x128xf32>
    %68 = vector.shape_cast %65 : vector<2x128xf32> to vector<1x1x2x128xf32>
    tpu.vector_store %arg4[%c0_25, %c0_26, %c0_27, %c0_28], %68 {strides = array<i32>} : memref<1x3x2x128xf32, #tpu.memory_space<vmem>>, vector<1x1x2x128xf32>,
    %cst_29 = arith.constant 3.000000e+00 : f32
    %69 = vector.broadcast %cst_29 : f32 to vector<2x128xf32>
    %70 = arith.addf %49, %69 : vector<2x128xf32>
    %cst_30 = arith.constant 6.000000e+00 : f32
    %71 = vector.broadcast %cst_30 : f32 to vector<2x128xf32>
    %72 = arith.cmpf oge, %70, %71 : vector<2x128xf32>
    %cst_31 = arith.constant 6.000000e+00 : f32
    %73 = vector.broadcast %cst_31 : f32 to vector<2x128xf32>
    %74 = arith.subf %70, %73 : vector<2x128xf32>
    %75 = arith.select %72, %74, %70 : vector<2x128xi1>, vector<2x128xf32>
    %cst_32 = arith.constant 4.000000e+00 : f32
    %76 = vector.broadcast %cst_32 : f32 to vector<2x128xf32>
    %77 = arith.subf %76, %75 : vector<2x128xf32>
    %78 = arith.minimumf %75, %77 : vector<2x128xf32>
    %cst_33 = arith.constant 0.000000e+00 : f32
    %cst_34 = arith.constant 1.000000e+00 : f32
    %79 = vector.broadcast %cst_33 : f32 to vector<2x128xf32>
    %80 = arith.maximumf %79, %78 : vector<2x128xf32>
    %81 = vector.broadcast %cst_34 : f32 to vector<2x128xf32>
    %82 = arith.minimumf %81, %80 : vector<2x128xf32>
    %83 = arith.mulf %12, %82 : vector<2x128xf32>
    %84 = arith.subf %9, %83 : vector<2x128xf32>
    %c0_35 = arith.constant 0 : index
    %c1_36 = arith.constant 1 : index
    %c0_37 = arith.constant 0 : index
    %c0_38 = arith.constant 0 : index
    %85 = vector.load %arg4[%c0_35, %c1_36, %c0_37, %c0_38] : memref<1x3x2x128xf32, #tpu.memory_space<vmem>>, vector<1x1x2x128xf32>
    %86 = vector.shape_cast %85 : vector<1x1x2x128xf32> to vector<2x128xf32>
    %87 = vector.shape_cast %84 : vector<2x128xf32> to vector<1x1x2x128xf32>
    tpu.vector_store %arg4[%c0_35, %c1_36, %c0_37, %c0_38], %87 {strides = array<i32>} : memref<1x3x2x128xf32, #tpu.memory_space<vmem>>, vector<1x1x2x128xf32>,
    %cst_39 = arith.constant 1.000000e+00 : f32
    %88 = vector.broadcast %cst_39 : f32 to vector<2x128xf32>
    %89 = arith.addf %49, %88 : vector<2x128xf32>
    %cst_40 = arith.constant 6.000000e+00 : f32
    %90 = vector.broadcast %cst_40 : f32 to vector<2x128xf32>
    %91 = arith.cmpf oge, %89, %90 : vector<2x128xf32>
    %cst_41 = arith.constant 6.000000e+00 : f32
    %92 = vector.broadcast %cst_41 : f32 to vector<2x128xf32>
    %93 = arith.subf %89, %92 : vector<2x128xf32>
    %94 = arith.select %91, %93, %89 : vector<2x128xi1>, vector<2x128xf32>
    %cst_42 = arith.constant 4.000000e+00 : f32
    %95 = vector.broadcast %cst_42 : f32 to vector<2x128xf32>
    %96 = arith.subf %95, %94 : vector<2x128xf32>
    %97 = arith.minimumf %94, %96 : vector<2x128xf32>
    %cst_43 = arith.constant 0.000000e+00 : f32
    %cst_44 = arith.constant 1.000000e+00 : f32
    %98 = vector.broadcast %cst_43 : f32 to vector<2x128xf32>
    %99 = arith.maximumf %98, %97 : vector<2x128xf32>
    %100 = vector.broadcast %cst_44 : f32 to vector<2x128xf32>
    %101 = arith.minimumf %100, %99 : vector<2x128xf32>
    %102 = arith.mulf %12, %101 : vector<2x128xf32>
    %103 = arith.subf %9, %102 : vector<2x128xf32>
    %c0_45 = arith.constant 0 : index
    %c2_46 = arith.constant 2 : index
    %c0_47 = arith.constant 0 : index
    %c0_48 = arith.constant 0 : index
    %104 = vector.load %arg4[%c0_45, %c2_46, %c0_47, %c0_48] : memref<1x3x2x128xf32, #tpu.memory_space<vmem>>, vector<1x1x2x128xf32>
    %105 = vector.shape_cast %104 : vector<1x1x2x128xf32> to vector<2x128xf32>
    %106 = vector.shape_cast %103 : vector<2x128xf32> to vector<1x1x2x128xf32>
    tpu.vector_store %arg4[%c0_45, %c2_46, %c0_47, %c0_48], %106 {strides = array<i32>} : memref<1x3x2x128xf32, #tpu.memory_space<vmem>>, vector<1x1x2x128xf32>,
    return
  }
  func.func @transform_0(%arg0: i32, %arg1: i32, %arg2: memref<2xf32, #tpu.memory_space<smem>>) -> (i32, i32, i32, i32) {
    %c0_i32 = arith.constant 0 : i32
    %c0_i32_0 = arith.constant 0 : i32
    %c0_i32_1 = arith.constant 0 : i32
    return %arg0, %c0_i32, %arg1, %c0_i32_0 : i32, i32, i32, i32
  }
  func.func @transform_1(%arg0: i32, %arg1: i32, %arg2: memref<2xf32, #tpu.memory_space<smem>>) -> (i32, i32, i32, i32) {
    %c0_i32 = arith.constant 0 : i32
    %c0_i32_0 = arith.constant 0 : i32
    %c0_i32_1 = arith.constant 0 : i32
    return %arg0, %c0_i32, %arg1, %c0_i32_0 : i32, i32, i32, i32
  }
}

</mosaic_0001>

<bundles_post_ra>
// kernel: tpu_custom_call.1
= control target key start
LH: loop header
LB: loop body
LE: loop exit
PB: predicated region body
PF: predicated region fallthrough
CT: control target
= control target key end

     0   :  { %s540_s9 = smov [#allocation3]   ;;  %s724_s0 = inlined_call_operand.hbm [shape: f32[2], index: 0, kind: input, shape index: {}]   ;;  %s725_s1 = inlined_call_operand.hbm [shape: f32[2,3,2,128], index: 1, kind: input, shape index: {}]   ;;  %s726_s2 = inlined_call_operand.hbm [shape: f32[2,3,2,128], index: 2, kind: output, shape index: {}]  }
   0x1   :  { %8 = dma.hbm_to_smem %s724_s0, 16, %s540_s9, [#allocation2] }
   0x2   :  { %506 = dma.done.wait [#allocation2], 16 }
   0x3   :  { %507 = vsyncadd [#allocation2], 4294967280 }
   0x4   :  { %10 = sfence }
   0x5   :  { %11 = vsyncpa [#allocation5], 0 }
   0x6   :  { %13 = vsyncpa [#allocation5 + $0x1], 0 }
   0x7   :  { %14 = vsyncpa [#allocation6], 0 }
   0x8   :  { %16 = vsyncpa [#allocation6 + $0x1], 0  ;;  %s565_s12 = smov 0   ;;  %s567_s13 = smov 0  }
   0x9   :  { %s569_s14 = smov 0   ;;  %s571_s15 = smov 0  }
   0xa   :  { %s573_s16 = smov 0   ;;  %s575_s17 = smov 0  }
   0xb LB: > { %s330_s0 = sadd.s32 4294967295, %s538_s17   ;;  %s331_s18 = sadd.s32 4294967294, %s538_s17   ;;  %s538_s17 = sphi %s575_s17, %s22_s17   ;;  %s534_s16 = sphi %s573_s16, %s737_s16   ;;  %s530_s15 = sphi %s571_s15, %s736_s15   ;;  %s526_s14 = sphi %s569_s14, %s735_s14   ;;  %s522_s13 = sphi %s567_s13, %s734_s13   ;;  %s518_s12 = sphi %s565_s12, %s733_s12  }
   0xc   : > { %s34_s19 = sadd.s32 1, %s534_s16  ;;  %s43_s20 = sadd.s32 1, %s526_s14 }
   0xd   : > { %p36_p0 = scmp.ge.s32.totalorder %s34_s19, 2  ;;  %p50_p1 = scmp.ne.s32.totalorder %s526_s14, %s522_s13 }
   0xe   : > { %p51_p2 = scmp.eq.s32.totalorder %s538_s17, 0  ;;  %p56_p3 = scmp.ne.s32.totalorder %s522_s13, %s518_s12 }
   0xf   : > { %s739_s19 = smov (%p36_p0, %s34_s19), 0  ;;  %p57_p5 = scmp.eq.s32.totalorder %s330_s0, 0 }
  0x10   : > { %p606_p4 = por %p51_p2, %p50_p1  ;;  %s38_s22 = ssub.s32 %s534_s16, %s739_s19 }
  0x11   : > { %p82_p6 = scmp.eq.s32.totalorder %s330_s0, 1  ;;  %p41_p7 = scmp.eq.s32.totalorder %s38_s22, 0 }
  0x12   : > { %p612_p8 = por %p57_p5, %p56_p3  ;;  %p88_p10 = scmp.eq.s32.totalorder %s331_s18, 1 }
  0x13   : > { %p616_p9 = por %p82_p6, %p50_p1  ;;  %p363_p13 = scmp.lt.s32.totalorder %s538_s17, 2 }
  0x14   : > { %s621_s25 = scalar_select %p41_p7, %s526_s14, %s43_s20  }
  0x15   : > { %p623_p11 = por %p88_p10, %p56_p3  ;;  %s108_s27 = sand.u32 1, %s526_s14  }
  0x16   : > { %s347_s28 = smul.u32 6, %s108_s27  ;;  %p633_p0 = pnand %p363_p13, %p606_p4 }
  0x17   : > { %s348_s29 = smul.u32 96, %s534_s16  ;;  %p335_p1 = scmp.ge.s32.totalorder %s538_s17, 1 }
  0x18   : > { %s112_s6 = scalar_lea.vmem [#allocation4], %s347_s28  ;;  %s109_s8 = scalar_lea.sflag [#allocation5], %s108_s27 }
  0x19   : > { %s119_s5 = scalar_lea.hbm %s725_s1, %s348_s29  ;;  %s120_s7 = sshll.u32 %s112_s6, 4  ;;  %s121_s7 = int_to_ptr.vmem [resolvable:$true] %s120_s7 }
  0x1a   : > { %p430_p2 = pneg %p633_p0  ;;  %s441_s9 = scalar_lea.vmem %s121_s7, 96 }
  0x1b   : > { %p442_p3 = scmp.ne.s32.totalorder %s121_s7, %s441_s9  ;;  %s541_s10 = smov [#allocation4]  }
  0x1c   : > { %s446_s11 = sshll.u32 %s541_s10, 4  ;;  %s447_s11 = int_to_ptr.vmem [resolvable:$false] %s446_s11 }
  0x1d   : > { %p444_p5 = pnand %p442_p3, %p430_p2  ;;  %s448_s0 = scalar_lea.vmem %s447_s11, 192 }
  0x1e   : > { %p449_p4 = scmp.lt.s32.totalorder %s121_s7, %s447_s11  ;;  %p450_p7 = scmp.lt.s32.totalorder %s448_s0, %s441_s9 }
  0x1f   : > { %p445_p6 = pneg %p444_p5 }
  0x20   : > { %p451_p10 = por %p450_p7, %p449_p4 }
  0x22   : > { %p452_p13 = pnand %p451_p10, %p445_p6 }
  0x24   : > { %455 = shalt.err (!%p452_p13)
}
  0x25   : > { %s542_s18 = smov 32   ;;  %s543_s20 = smov 2  }
  0x26   : > { %358 = dma.hbm_to_vmem [thread:$0]  (!%p633_p0), %s119_s5, 96, %s121_s7, %s109_s8, %s542_s18, %s542_s18, %s543_s20  }
  0x27   : > { %p128_p12 = scmp.lt.s32.totalorder %s538_s17, 3 }
  0x29   : > { %p129_p2 = pnand %p335_p1, %p128_p12 }
  0x2a   : > { %s649_s21 = sand.u32 (!%p129_p2), 1, %s522_s13  }
  0x2b   : > { %132 = sbr.rel (%p129_p2) target bundleno = 118 (0x76), region = 24  ;;  %s135_s27 = scalar_lea.sflag (!%p129_p2), [#allocation5], %s649_s21 }
  0x2c   : > { %s349_s22 = smul.u32 (!%p129_p2), 6, %s649_s21 }
  0x2e   : > { %s138_s28 = scalar_lea.vmem (!%p129_p2), [#allocation4], %s349_s22 }
  0x30   : > { %509 = dma.done.wait (%p612_p8), %s135_s27, 96  }
  0x31   : > { %511 = vsyncadd (%p612_p8), %s135_s27, 4294967200  ;;  %v158_v0 = vld [vmem:[%s138_s28] sm:$0x3]  ;;  %v336_v1 = vld [vmem:[%s138_s28 + $0x2] sm:$0x3]  ;;  %s157_s29 = sld [smem:[#allocation3 + %s530_s15]] }
  0x32   : > { %v337_v2 = vld [vmem:[%s138_s28 + $0x4] sm:$0x3]  ;;  %v163_v3 = vmax.f32 %v158_v0, %v336_v1  ;;  %v165_v4 = vmin.f32 %v158_v0, %v336_v1  ;;  %v180_v11 = vsub.f32 %v158_v0, %v336_v1  ;;  %s156_s23 = scalar_lea.vmem [#allocation7], %s349_s22  ;;  %s350_s3 = smul.u32 96, %s530_s15 }
  0x33   : > { %v172_v9 = vsub.f32 %v336_v1, %v337_v2  ;;  %v177_v10 = vsub.f32 %v337_v2, %v158_v0  ;;  %s245_s30 = sshll.u32 %s156_s23, 4  ;;  %s231_s15 = scalar_lea.sflag [#allocation6], %s649_s21  ;;  %s669_s30 = int_to_ptr.vmem [resolvable:$true] %s245_s30 }
  0x34   : > { %v659_v5 = vmax.f32 %v163_v3, %v337_v2  ;;  %v166_v6 = vmin.f32 %v165_v4, %v337_v2  ;;  %s676_s6 = scalar_lea.hbm %s726_s2, %s350_s3  ;;  %s456_s7 = scalar_lea.vmem %s669_s30, 96 }
  0x35   : > { %p457_p8 = scmp.ne.s32.totalorder %s669_s30, %s456_s7  ;;  %s544_s8 = smov [#allocation7]  }
  0x36   : > { %v167_v7 = vsub.f32 %v659_v5, %v166_v6  ;;  %vm183_vm1 = vcmp.eq.f32.partialorder %v659_v5, %v158_v0  ;;  %vm184_vm2 = vcmp.eq.f32.partialorder %v659_v5, %v336_v1  ;;  %s460_s9 = sshll.u32 %s544_s8, 4  ;;  %s461_s9 = int_to_ptr.vmem [resolvable:$false] %s460_s9 }
  0x37   : > { %v187_v19 = vstv %s157_s29  ;;  %p458_p12 = pnand %p457_p8, %p616_p9  ;;  %s462_s10 = scalar_lea.vmem %s461_s9, 192 }
  0x38   : > { %vm168_vm0 = vcmp.gt.f32.partialorder %v167_v7, 0.0  ;;  %p463_p1 = scmp.lt.s32.totalorder %s669_s30, %s461_s9  ;;  %p464_p3 = scmp.lt.s32.totalorder %s462_s10, %s456_s7 }
  0x39   : > { %v169_v8 = vsel %vm168_vm0, %v167_v7, 1.0  ;;  %p459_p0 = pneg %p458_p12 }
  0x3a   : > { %418 = vrcp.f32 %v169_v8  ;;  %p465_p5 = por %p464_p3, %p463_p1 }
  0x3c   : > { %p466_p6 = pnand %p465_p5, %p459_p0 }
  0x47   : > { %v419_v12 = vpop.eup %418 }
  0x48   : > { %v173_v13 = vmul.f32 %v419_v12, %v172_v9  ;;  %v178_v14 = vmul.f32 %v419_v12, %v177_v10  ;;  %v181_v15 = vmul.f32 %v419_v12, %v180_v11 }
  0x4a   : > { %vm174_vm3 = vcmp.lt.f32.partialorder %v173_v13, 0.0  ;;  %v175_v16 = vadd.f32 6.0, %v173_v13  ;;  %v179_v17 = vadd.f32 2.0, %v178_v14  ;;  %v182_v18 = vadd.f32 4.0, %v181_v15 }
  0x4c   : > { %v176_v20 = vsel %vm174_vm3, %v175_v16, %v173_v13  ;;  %v185_v21 = vsel %vm184_vm2, %v179_v17, %v182_v18 }
  0x4d   : > { %v186_v22 = vsel %vm183_vm1, %v176_v20, %v185_v21 }
  0x4e   : > { %v188_v23 = vadd.f32 %v187_v19, %v186_v22 }
  0x50   : > { %v190_v24 = vadd.f32 6.0, %v188_v23  ;;  %vm189_vm4 = vcmp.lt.f32.partialorder %v188_v23, 0.0 }
  0x52   : > { %v191_v25 = vsel %vm189_vm4, %v190_v24, %v188_v23 }
  0x53   : > { %vm192_vm5 = vcmp.ge.f32.partialorder %v191_v25, 6.0  ;;  %v338_v26 = vadd.f32 -6.0, %v191_v25 }
  0x55   : > { %v194_v27 = vsel %vm192_vm5, %v338_v26, %v191_v25 }
  0x56   : > { %v195_v28 = vadd.f32 5.0, %v194_v27  ;;  %v206_v29 = vadd.f32 3.0, %v194_v27  ;;  %v218_v30 = vadd.f32 1.0, %v194_v27 }
  0x58   : > { %vm196_vm6 = vcmp.ge.f32.partialorder %v195_v28, 6.0  ;;  %v339_v31 = vadd.f32 -6.0, %v195_v28  ;;  %vm207_vm7 = vcmp.ge.f32.partialorder %v206_v29, 6.0  ;;  %v340_v32 = vadd.f32 -6.0, %v206_v29 }
  0x59   : > { %vm219_vm8 = vcmp.ge.f32.partialorder %v218_v30, 6.0  ;;  %v342_v33 = vadd.f32 -6.0, %v218_v30 }
  0x5a   : > { %v198_v34 = vsel %vm196_vm6, %v339_v31, %v195_v28  ;;  %v209_v35 = vsel %vm207_vm7, %v340_v32, %v206_v29 }
  0x5b   : > { %v199_v36 = vsub.f32 4.0, %v198_v34  ;;  %v210_v37 = vsub.f32 4.0, %v209_v35  ;;  %v221_v38 = vsel %vm219_vm8, %v342_v33, %v218_v30 }
  0x5c   : > { %v222_v39 = vsub.f32 4.0, %v221_v38 }
  0x5d   : > { %v200_v40 = vmin.f32 %v198_v34, %v199_v36  ;;  %v211_v41 = vmin.f32 %v209_v35, %v210_v37 }
  0x5e   : > { %v223_v42 = vmin.f32 %v221_v38, %v222_v39 }
  0x5f   : > { %v201_v43 = vmax.f32 %v200_v40, 0.0  ;;  %v212_v44 = vmax.f32 %v211_v41, 0.0 }
  0x60   : > { %v224_v45 = vmax.f32 %v223_v42, 0.0 }
  0x61   : > { %v202_v46 = vmin.f32 %v201_v43, 1.0  ;;  %v213_v47 = vmin.f32 %v212_v44, 1.0 }
  0x62   : > { %v225_v48 = vmin.f32 %v224_v45, 1.0 }
  0x63   : > { %v203_v49 = vmul.f32 %v202_v46, %v167_v7  ;;  %v214_v50 = vmul.f32 %v213_v47, %v167_v7 }
  0x64   : > { %v226_v51 = vmul.f32 %v225_v48, %v167_v7 }
  0x65   : > { %v204_v52 = vsub.f32 %v659_v5, %v203_v49  ;;  %v215_v53 = vsub.f32 %v659_v5, %v214_v50 }
  0x66   : > { %v227_v54 = vsub.f32 %v659_v5, %v226_v51 }
  0x67   : > { %205 = vst [vmem:[%s156_s23] sm:$0x3] %v204_v52  ;;  %341 = vst [vmem:[%s156_s23 + $0x2] sm:$0x3] %v215_v53 }
  0x68   : > { %343 = vst [vmem:[%s156_s23 + $0x4] sm:$0x3] %v227_v54 }
  0x69   : > { %469 = shalt.err (!%p466_p6)
}
  0x6a   : > { %s470_s11 = scalar_lea.hbm %s676_s6, 96  ;;  %s474_s20 = scalar_lea.hbm %s726_s2, 192 }
  0x6b   : > { %p471_p4 = scmp.ne.s32.totalorder %s676_s6, %s470_s11  ;;  %p475_p13 = scmp.lt.s32.totalorder %s676_s6, %s726_s2 }
  0x6c   : > { %p476_p2 = scmp.lt.s32.totalorder %s474_s20, %s470_s11 }
  0x6d   : > { %p472_p7 = pnand %p471_p4, %p616_p9 }
  0x6e   : > { %p477_p8 = por %p476_p2, %p475_p13 }
  0x6f   : > { %p473_p10 = pneg %p472_p7 }
  0x71   : > { %p478_p12 = pnand %p477_p8, %p473_p10 }
  0x73   : > { %481 = shalt.err (!%p478_p12)
}
  0x74   : > { %s545_s28 = smov 32   ;;  %s546_s29 = smov 2  }
  0x75   : > { %353 = dma.vmem_to_hbm [thread:$0]  (%p616_p9), %s669_s30, 96, %s676_s6, %s231_s15, %s545_s28, %s545_s28, %s546_s29  }
  0x76 PF: > { %s260_s23 = sand.u32 1, %s518_s12   ;;  %p732_p0 = scmp.ge.s32.totalorder %s538_s17, 2 }
  0x77   : > { %s261_s3 = scalar_lea.sflag [#allocation6], %s260_s23 }
  0x78   : > { %p360_p1 = pnand %p732_p0, %p623_p11 }
  0x7a   : > { %p361_p3 = pneg %p360_p1 }
  0x7c   : > { %513 = dma.done.wait (%p361_p3), %s261_s3, 96  }
  0x7d   : > { %515 = vsyncadd (%p361_p3), %s261_s3, 4294967200  ;;  %s22_s17 = sadd.s32 1, %s538_s17   ;;  %s733_s12 = smov %s522_s13 }
  0x7e   : > { %p19_p5 = scmp.ge.s32.totalorder %s22_s17, 4   ;;  %s734_s13 = smov %s526_s14 }
  0x7f   : > { %s735_s14 = smov %s621_s25  ;;  %s736_s15 = smov %s534_s16 }
  0x80   : > { %s737_s16 = smov %s739_s19  ;;  %21 = sbr.rel (!%p19_p5) target bundleno = 11 (0xb), region = 73 }
  0x85   :  { %266 = vsyncpa [#allocation5], 1 }
  0x86   :  { %268 = vsyncpa [#allocation5 + $0x1], 1 }
  0x87   :  { %269 = vsyncpa [#allocation6], 1 }
  0x88   :  { %271 = vsyncpa [#allocation6 + $0x1], 1 }

</bundles_post_ra>
